<compile_context>
chip_gen: v7x
topology: tpu7x:2x2x1
jax: 0.10.0
libtpu: 0.0.40
codegen_flags: <defaults>
</compile_context>

<pallas_src>
import functools

import jax
import jax.numpy as jnp
from jax.experimental import pallas as pl
from jax.experimental.pallas import tpu as pltpu

LN_EPS = 1e-5


def _pick_batch_tile(B):
    """Prefer 128-row tiles (fills v5e's 128-wide MXU M dim, bounded vreg
    pressure everywhere) and guarantee >=2 grid steps when possible (both v7x
    TensorCores get work; pipeline has something to overlap)."""
    for tb in (128, 64, 32, 16, 8):
        if B % tb == 0 and B // tb >= 2:
            return tb
    return B  # tiny / odd batch: block equals the full array dim (always legal)


def prepare_params(params, *, input_dim_c, input_dim_r, embed_dim):
    """One-time, parameter-load-time preprocessing. Keep OUT of the per-call
    jitted path: the (E, D*E) permute + f32->bf16 casts are ~3x the kernel's
    own W2 DMA bytes and must not run per invocation."""
    C = input_dim_c
    D = input_dim_c + input_dim_r
    E = embed_dim
    DE = D * E
    w1, b1, w2, b2, gamma, beta = params

    # Permute W2 columns from k = e*D + d to k' = d*E + e so each fixed-d slab
    # W2_p[:, d*E:(d+1)*E] is a contiguous column slice in-kernel.
    w2_p = w2.reshape(E, E, D).transpose(0, 2, 1).reshape(E, DE)
    b2_p = b2.reshape(E, D).T.reshape(DE)

    return (
        w1.astype(jnp.bfloat16),                 # (C, E)   MXU operand
        b1.reshape(1, E).astype(jnp.float32),    # (1, E)
        w2_p.astype(jnp.bfloat16),               # (E, DE)  MXU operand (permuted)
        b2_p.reshape(1, DE).astype(jnp.float32), # (1, DE)  (permuted)
        gamma.reshape(1, D).astype(jnp.float32), # (1, D)
        beta.reshape(1, D).astype(jnp.float32),  # (1, D)
    )


@functools.partial(jax.jit,
                   static_argnames=("input_dim_c", "input_dim_r", "embed_dim"))
def intervention_weight_model(x, intervention_idxs, prepared,
                              *, input_dim_c, input_dim_r, embed_dim):
    B = x.shape[0]
    C = input_dim_c
    D = input_dim_c + input_dim_r
    E = embed_dim
    DE = D * E
    TB = _pick_batch_tile(B)

    w1_bf, b1_2d, w2_bf, b2_2d, gamma_2d, beta_2d = prepared

    def kernel(x_ref, idx_ref, w1_ref, b1_ref, w2_ref, b2_ref,
               g_ref, bta_ref, o_ref):
        # ---- LayerNorm(x), f32, one-pass stats (two reduces issue together) ----
        xv = x_ref[...].astype(jnp.float32)
        inv_d = jnp.float32(1.0 / D)
        mean = jnp.sum(xv, axis=-1, keepdims=True) * inv_d
        mean_sq = jnp.sum(xv * xv, axis=-1, keepdims=True) * inv_d
        var = mean_sq - mean * mean
        norm = (xv - mean) * jax.lax.rsqrt(var + LN_EPS)
        norm = norm * g_ref[...] + bta_ref[...]                        # (TB, D)

        # ---- weight_predictor layer 1: bf16 MXU matmul, f32 accum, ReLU ----
        h = jnp.dot(idx_ref[...].astype(jnp.bfloat16), w1_ref[...],
                    preferred_element_type=jnp.float32) + b1_ref[...]  # (TB, E)
        h = jnp.maximum(h, 0.0).astype(jnp.bfloat16)

        # ---- Slab-fused layer 2 + bmm contraction ----
        # Column-permuted W2 => out = sum_d norm[:, d] * (h @ W2_p[:, d*E:(d+1)*E] + b2_d)
        # Per-d slab is loaded straight from VMEM (ref slice), matmul'd on the
        # MXU, and FMA'd into round-robin partial accumulators (breaks the
        # serial acc chain; exposes VALU ILP). (TB, D*E) is never materialized.
        # D is small and static -> Python unroll; for large D this would become
        # a lax.fori_loop(..., unroll=4) or a second ("arbitrary") grid axis.
        n_acc = min(4, max(D, 1))
        accs = [jnp.zeros((TB, E), jnp.float32) for _ in range(n_acc)]
        for d in range(D):
            slab = jnp.dot(h, w2_ref[:, d * E:(d + 1) * E],
                           preferred_element_type=jnp.float32)          # (TB, E)
            slab = slab + b2_ref[:, d * E:(d + 1) * E]
            accs[d % n_acc] = accs[d % n_acc] + norm[:, d:d + 1] * slab
        acc = accs[0]
        for a in accs[1:]:
            acc = acc + a

        o_ref[...] = acc.astype(o_ref.dtype)

    batch_map = lambda i: (i, 0)   # tiles indexed by batch grid step
    const_map = lambda i: (0, 0)   # weights: same block every step (stay resident)

    in_specs = [
        pl.BlockSpec((TB, D), batch_map),     # x
        pl.BlockSpec((TB, C), batch_map),     # intervention_idxs
        pl.BlockSpec((C, E), const_map),      # W1 (bf16)
        pl.BlockSpec((1, E), const_map),      # b1
        pl.BlockSpec((E, DE), const_map),     # W2 permuted (bf16)
        pl.BlockSpec((1, DE), const_map),     # b2 permuted
        pl.BlockSpec((1, D), const_map),      # gamma
        pl.BlockSpec((1, D), const_map),      # beta
    ]

    # VMEM budget: resident weights + double-buffered batch tiles + intermediates.
    resident = C * E * 2 + E * 4 + E * DE * 2 + DE * 4 + 2 * D * 4
    pipelined = 2 * (TB * D * 4 + TB * C * 4 + TB * E * 4)
    live = (6 * TB * E * 4) + 3 * TB * D * 4        # h, slab, partial accs, norm/x
    est = resident + pipelined + live
    vmem_limit = int(min(max(2 * est, 16 * 1024 * 1024), 40 * 1024 * 1024))

    flops = 2 * B * C * E + 2 * B * E * D * E + 3 * B * D * E + 8 * B * D
    bytes_accessed = (B * D * 4 + B * C * 4 + C * E * 2 + E * 4
                      + E * DE * 2 + DE * 4 + 2 * D * 4 + B * E * 4)

    out = pl.pallas_call(
        kernel,
        out_shape=jax.ShapeDtypeStruct((B, E), jnp.float32),
        grid=(B // TB,),
        in_specs=in_specs,
        out_specs=pl.BlockSpec((TB, E), batch_map),
        compiler_params=pltpu.CompilerParams(
            dimension_semantics=("parallel",),   # shard batch tiles across TCs (v7x)
            vmem_limit_bytes=vmem_limit),
        cost_estimate=pl.CostEstimate(flops=flops,
                                      transcendentals=B,
                                      bytes_accessed=bytes_accessed),
    )(x, intervention_idxs, w1_bf, b1_2d, w2_bf, b2_2d, gamma_2d, beta_2d)
    return out


def _reference(x, intervention_idxs, params, input_dim_c, input_dim_r, embed_dim,
               matmul_dtype=jnp.float32):
    """Pure-JAX reference mirroring the PyTorch forward (optionally bf16 matmuls)."""
    D = input_dim_c + input_dim_r
    E = embed_dim
    w1, b1, w2, b2, gamma, beta = params
    mean = jnp.mean(x, axis=-1, keepdims=True)
    var = jnp.mean(jnp.square(x - mean), axis=-1, keepdims=True)
    norm = (x - mean) / jnp.sqrt(var + LN_EPS) * gamma + beta
    idxf = intervention_idxs.astype(matmul_dtype)
    h = jnp.maximum(
        jnp.dot(idxf, w1.astype(matmul_dtype),
                preferred_element_type=jnp.float32) + b1, 0.0)
    wflat = jnp.dot(h.astype(matmul_dtype), w2.astype(matmul_dtype),
                    preferred_element_type=jnp.float32) + b2
    weights = wflat.reshape(x.shape[0], E, D)
    return jnp.einsum("bed,bd->be", weights, norm)


if __name__ == "__main__":
    # Small, forward-consistent shapes.
    B = 2
    input_dim_c = 4
    input_dim_r = 4
    embed_dim = 32
    D = input_dim_c + input_dim_r

    key = jax.random.PRNGKey(0)
    kx, kidx, kw1, kb1, kw2, kb2 = jax.random.split(key, 6)

    x = jax.random.normal(kx, (B, D), dtype=jnp.float32)
    intervention_idxs = jax.random.bernoulli(
        kidx, 0.5, (B, input_dim_c)).astype(jnp.float32)

    # Parameters stored as (in, out) so forward is x @ W + b.
    w1 = 0.1 * jax.random.normal(kw1, (input_dim_c, embed_dim), dtype=jnp.float32)
    b1 = 0.1 * jax.random.normal(kb1, (embed_dim,), dtype=jnp.float32)
    w2 = 0.1 * jax.random.normal(kw2, (embed_dim, D * embed_dim), dtype=jnp.float32)
    b2 = 0.1 * jax.random.normal(kb2, (D * embed_dim,), dtype=jnp.float32)
    gamma = jnp.ones((D,), dtype=jnp.float32)   # LayerNorm default init
    beta = jnp.zeros((D,), dtype=jnp.float32)
    params = (w1, b1, w2, b2, gamma, beta)

    # One-time (load-time) preprocessing -- deliberately outside the jitted call.
    prepared = prepare_params(params, input_dim_c=input_dim_c,
                              input_dim_r=input_dim_r, embed_dim=embed_dim)
    prepared = jax.block_until_ready(prepared)

    out = intervention_weight_model(
        x, intervention_idxs, prepared,
        input_dim_c=input_dim_c, input_dim_r=input_dim_r, embed_dim=embed_dim)
    out = jax.block_until_ready(out)
    assert out.shape == (B, embed_dim)

    # Tight check vs. a precision-matched (bf16-matmul) reference.
    ref_bf = _reference(x, intervention_idxs, params,
                        input_dim_c, input_dim_r, embed_dim,
                        matmul_dtype=jnp.bfloat16)
    assert jnp.allclose(out, ref_bf, rtol=1e-3, atol=1e-3), \
        "mismatch vs bf16-matched reference"

    # Loose check vs. the full-f32 reference (bf16 MXU inputs bound the error).
    # Note: intervention_idxs are 0/1 masks, so their bf16 cast is exact.
    ref_f32 = _reference(x, intervention_idxs, params,
                         input_dim_c, input_dim_r, embed_dim,
                         matmul_dtype=jnp.float32)
    assert jnp.allclose(out, ref_f32, rtol=3e-2, atol=3e-2), \
        "mismatch vs f32 reference"

    print("KERNEL_OK")
</pallas_src>

<mosaic_0001>
module attributes {stable_mosaic.version = 11 : i64} {
  func.func @kernel(%arg0: i32, %arg1: memref<2x8xf32, #tpu.memory_space<vmem>>, %arg2: memref<2x4xf32, #tpu.memory_space<vmem>>, %arg3: memref<4x32xbf16, #tpu.memory_space<vmem>>, %arg4: memref<1x32xf32, #tpu.memory_space<vmem>>, %arg5: memref<32x256xbf16, #tpu.memory_space<vmem>>, %arg6: memref<1x256xf32, #tpu.memory_space<vmem>>, %arg7: memref<1x8xf32, #tpu.memory_space<vmem>>, %arg8: memref<1x8xf32, #tpu.memory_space<vmem>>, %arg9: memref<2x32xf32, #tpu.memory_space<vmem>>) attributes {dimension_semantics = [#tpu.dimension_semantics<parallel>], iteration_bounds = array<i64: 1>, scalar_prefetch = 0 : i64, scratch_operands = 0 : i64, tpu.core_type = #tpu.core_type<tc>, window_params = [{transform_indices = @transform_0, window_bounds = array<i64: 2, 8>}, {transform_indices = @transform_1, window_bounds = array<i64: 2, 4>}, {pipeline_mode = #tpu.pipeline_mode<synchronous>, transform_indices = @transform_2, window_bounds = array<i64: 4, 32>}, {pipeline_mode = #tpu.pipeline_mode<synchronous>, transform_indices = @transform_3, window_bounds = array<i64: 1, 32>}, {pipeline_mode = #tpu.pipeline_mode<synchronous>, transform_indices = @transform_4, window_bounds = array<i64: 32, 256>}, {pipeline_mode = #tpu.pipeline_mode<synchronous>, transform_indices = @transform_5, window_bounds = array<i64: 1, 256>}, {pipeline_mode = #tpu.pipeline_mode<synchronous>, transform_indices = @transform_6, window_bounds = array<i64: 1, 8>}, {pipeline_mode = #tpu.pipeline_mode<synchronous>, transform_indices = @transform_7, window_bounds = array<i64: 1, 8>}, {transform_indices = @transform_8, window_bounds = array<i64: 2, 32>}]} {
    %c0 = arith.constant 0 : index
    %c0_0 = arith.constant 0 : index
    %0 = vector.load %arg1[%c0, %c0_0] : memref<2x8xf32, #tpu.memory_space<vmem>>, vector<2x8xf32>
    %cst = arith.constant dense<0.000000e+00> : vector<2xf32>
    %1 = vector.multi_reduction <add>, %0, %cst [1] : vector<2x8xf32> to vector<2xf32>
    %2 = vector.shape_cast %1 : vector<2xf32> to vector<2x1xf32>
    %cst_1 = arith.constant 1.250000e-01 : f32
    %3 = vector.broadcast %cst_1 : f32 to vector<2x1xf32>
    %4 = arith.mulf %2, %3 : vector<2x1xf32>
    %5 = arith.mulf %0, %0 : vector<2x8xf32>
    %cst_2 = arith.constant dense<0.000000e+00> : vector<2xf32>
    %6 = vector.multi_reduction <add>, %5, %cst_2 [1] : vector<2x8xf32> to vector<2xf32>
    %7 = vector.shape_cast %6 : vector<2xf32> to vector<2x1xf32>
    %cst_3 = arith.constant 1.250000e-01 : f32
    %8 = vector.broadcast %cst_3 : f32 to vector<2x1xf32>
    %9 = arith.mulf %7, %8 : vector<2x1xf32>
    %10 = arith.mulf %4, %4 : vector<2x1xf32>
    %11 = arith.subf %9, %10 : vector<2x1xf32>
    %12 = vector.broadcast %4 : vector<2x1xf32> to vector<2x8xf32>
    %13 = arith.subf %0, %12 : vector<2x8xf32>
    %cst_4 = arith.constant 9.99999974E-6 : f32
    %14 = vector.broadcast %cst_4 : f32 to vector<2x1xf32>
    %15 = arith.addf %11, %14 : vector<2x1xf32>
    %16 = math.rsqrt %15 : vector<2x1xf32>
    %17 = vector.broadcast %16 : vector<2x1xf32> to vector<2x8xf32>
    %18 = arith.mulf %13, %17 : vector<2x8xf32>
    %c0_5 = arith.constant 0 : index
    %c0_6 = arith.constant 0 : index
    %19 = vector.load %arg7[%c0_5, %c0_6] : memref<1x8xf32, #tpu.memory_space<vmem>>, vector<1x8xf32>
    %20 = vector.broadcast %19 : vector<1x8xf32> to vector<2x8xf32>
    %21 = arith.mulf %18, %20 : vector<2x8xf32>
    %c0_7 = arith.constant 0 : index
    %c0_8 = arith.constant 0 : index
    %22 = vector.load %arg8[%c0_7, %c0_8] : memref<1x8xf32, #tpu.memory_space<vmem>>, vector<1x8xf32>
    %23 = vector.broadcast %22 : vector<1x8xf32> to vector<2x8xf32>
    %24 = arith.addf %21, %23 : vector<2x8xf32>
    %c0_9 = arith.constant 0 : index
    %c0_10 = arith.constant 0 : index
    %25 = vector.load %arg2[%c0_9, %c0_10] : memref<2x4xf32, #tpu.memory_space<vmem>>, vector<2x4xf32>
    %26 = arith.truncf %25 : vector<2x4xf32> to vector<2x4xbf16>
    %c0_11 = arith.constant 0 : index
    %c0_12 = arith.constant 0 : index
    %27 = vector.load %arg3[%c0_11, %c0_12] : memref<4x32xbf16, #tpu.memory_space<vmem>>, vector<4x32xbf16>
    %cst_13 = arith.constant dense<0.000000e+00> : vector<2x32xf32>
    %28 = tpu.matmul %26, %27, %cst_13 {dimension_numbers = #tpu.dot_dimension_numbers<[1], [0], [0], [1], [0, 0, 1, 1], [], []>} : vector<2x4xbf16>, vector<4x32xbf16>, vector<2x32xf32> -> vector<2x32xf32>
    %c0_14 = arith.constant 0 : index
    %c0_15 = arith.constant 0 : index
    %29 = vector.load %arg4[%c0_14, %c0_15] : memref<1x32xf32, #tpu.memory_space<vmem>>, vector<1x32xf32>
    %30 = vector.broadcast %29 : vector<1x32xf32> to vector<2x32xf32>
    %31 = arith.addf %28, %30 : vector<2x32xf32>
    %cst_16 = arith.constant 0.000000e+00 : f32
    %32 = vector.broadcast %cst_16 : f32 to vector<2x32xf32>
    %33 = arith.maximumf %31, %32 : vector<2x32xf32>
    %34 = arith.truncf %33 : vector<2x32xf32> to vector<2x32xbf16>
    %cst_17 = arith.constant 0.000000e+00 : f32
    %35 = vector.broadcast %cst_17 : f32 to vector<2x32xf32>
    %cst_18 = arith.constant 0.000000e+00 : f32
    %36 = vector.broadcast %cst_18 : f32 to vector<2x32xf32>
    %cst_19 = arith.constant 0.000000e+00 : f32
    %37 = vector.broadcast %cst_19 : f32 to vector<2x32xf32>
    %cst_20 = arith.constant 0.000000e+00 : f32
    %38 = vector.broadcast %cst_20 : f32 to vector<2x32xf32>
    %c0_21 = arith.constant 0 : index
    %c0_22 = arith.constant 0 : index
    %39 = vector.load %arg5[%c0_21, %c0_22] : memref<32x256xbf16, #tpu.memory_space<vmem>>, vector<32x32xbf16>
    %cst_23 = arith.constant dense<0.000000e+00> : vector<2x32xf32>
    %40 = tpu.matmul %34, %39, %cst_23 {dimension_numbers = #tpu.dot_dimension_numbers<[1], [0], [0], [1], [0, 0, 1, 1], [], []>} : vector<2x32xbf16>, vector<32x32xbf16>, vector<2x32xf32> -> vector<2x32xf32>
    %c0_24 = arith.constant 0 : index
    %c0_25 = arith.constant 0 : index
    %41 = vector.load %arg6[%c0_24, %c0_25] : memref<1x256xf32, #tpu.memory_space<vmem>>, vector<1x32xf32>
    %42 = vector.broadcast %41 : vector<1x32xf32> to vector<2x32xf32>
    %43 = arith.addf %40, %42 : vector<2x32xf32>
    %44 = vector.extract_strided_slice %24 {offsets = [0, 0], sizes = [2, 1], strides = [1, 1]} : vector<2x8xf32> to vector<2x1xf32>
    %45 = vector.broadcast %44 : vector<2x1xf32> to vector<2x32xf32>
    %46 = arith.mulf %45, %43 : vector<2x32xf32>
    %47 = arith.addf %35, %46 : vector<2x32xf32>
    %c0_26 = arith.constant 0 : index
    %c32 = arith.constant 32 : index
    %48 = vector.load %arg5[%c0_26, %c32] : memref<32x256xbf16, #tpu.memory_space<vmem>>, vector<32x32xbf16>
    %cst_27 = arith.constant dense<0.000000e+00> : vector<2x32xf32>
    %49 = tpu.matmul %34, %48, %cst_27 {dimension_numbers = #tpu.dot_dimension_numbers<[1], [0], [0], [1], [0, 0, 1, 1], [], []>} : vector<2x32xbf16>, vector<32x32xbf16>, vector<2x32xf32> -> vector<2x32xf32>
    %c0_28 = arith.constant 0 : index
    %c32_29 = arith.constant 32 : index
    %50 = vector.load %arg6[%c0_28, %c32_29] : memref<1x256xf32, #tpu.memory_space<vmem>>, vector<1x32xf32>
    %51 = vector.broadcast %50 : vector<1x32xf32> to vector<2x32xf32>
    %52 = arith.addf %49, %51 : vector<2x32xf32>
    %53 = vector.extract_strided_slice %24 {offsets = [0, 1], sizes = [2, 1], strides = [1, 1]} : vector<2x8xf32> to vector<2x1xf32>
    %54 = vector.broadcast %53 : vector<2x1xf32> to vector<2x32xf32>
    %55 = arith.mulf %54, %52 : vector<2x32xf32>
    %56 = arith.addf %36, %55 : vector<2x32xf32>
    %c0_30 = arith.constant 0 : index
    %c64 = arith.constant 64 : index
    %57 = vector.load %arg5[%c0_30, %c64] : memref<32x256xbf16, #tpu.memory_space<vmem>>, vector<32x32xbf16>
    %cst_31 = arith.constant dense<0.000000e+00> : vector<2x32xf32>
    %58 = tpu.matmul %34, %57, %cst_31 {dimension_numbers = #tpu.dot_dimension_numbers<[1], [0], [0], [1], [0, 0, 1, 1], [], []>} : vector<2x32xbf16>, vector<32x32xbf16>, vector<2x32xf32> -> vector<2x32xf32>
    %c0_32 = arith.constant 0 : index
    %c64_33 = arith.constant 64 : index
    %59 = vector.load %arg6[%c0_32, %c64_33] : memref<1x256xf32, #tpu.memory_space<vmem>>, vector<1x32xf32>
    %60 = vector.broadcast %59 : vector<1x32xf32> to vector<2x32xf32>
    %61 = arith.addf %58, %60 : vector<2x32xf32>
    %62 = vector.extract_strided_slice %24 {offsets = [0, 2], sizes = [2, 1], strides = [1, 1]} : vector<2x8xf32> to vector<2x1xf32>
    %63 = vector.broadcast %62 : vector<2x1xf32> to vector<2x32xf32>
    %64 = arith.mulf %63, %61 : vector<2x32xf32>
    %65 = arith.addf %37, %64 : vector<2x32xf32>
    %c0_34 = arith.constant 0 : index
    %c96 = arith.constant 96 : index
    %66 = vector.load %arg5[%c0_34, %c96] : memref<32x256xbf16, #tpu.memory_space<vmem>>, vector<32x32xbf16>
    %cst_35 = arith.constant dense<0.000000e+00> : vector<2x32xf32>
    %67 = tpu.matmul %34, %66, %cst_35 {dimension_numbers = #tpu.dot_dimension_numbers<[1], [0], [0], [1], [0, 0, 1, 1], [], []>} : vector<2x32xbf16>, vector<32x32xbf16>, vector<2x32xf32> -> vector<2x32xf32>
    %c0_36 = arith.constant 0 : index
    %c96_37 = arith.constant 96 : index
    %68 = vector.load %arg6[%c0_36, %c96_37] : memref<1x256xf32, #tpu.memory_space<vmem>>, vector<1x32xf32>
    %69 = vector.broadcast %68 : vector<1x32xf32> to vector<2x32xf32>
    %70 = arith.addf %67, %69 : vector<2x32xf32>
    %71 = vector.extract_strided_slice %24 {offsets = [0, 3], sizes = [2, 1], strides = [1, 1]} : vector<2x8xf32> to vector<2x1xf32>
    %72 = vector.broadcast %71 : vector<2x1xf32> to vector<2x32xf32>
    %73 = arith.mulf %72, %70 : vector<2x32xf32>
    %74 = arith.addf %38, %73 : vector<2x32xf32>
    %c0_38 = arith.constant 0 : index
    %c128 = arith.constant 128 : index
    %75 = vector.load %arg5[%c0_38, %c128] : memref<32x256xbf16, #tpu.memory_space<vmem>>, vector<32x32xbf16>
    %cst_39 = arith.constant dense<0.000000e+00> : vector<2x32xf32>
    %76 = tpu.matmul %34, %75, %cst_39 {dimension_numbers = #tpu.dot_dimension_numbers<[1], [0], [0], [1], [0, 0, 1, 1], [], []>} : vector<2x32xbf16>, vector<32x32xbf16>, vector<2x32xf32> -> vector<2x32xf32>
    %c0_40 = arith.constant 0 : index
    %c128_41 = arith.constant 128 : index
    %77 = vector.load %arg6[%c0_40, %c128_41] : memref<1x256xf32, #tpu.memory_space<vmem>>, vector<1x32xf32>
    %78 = vector.broadcast %77 : vector<1x32xf32> to vector<2x32xf32>
    %79 = arith.addf %76, %78 : vector<2x32xf32>
    %80 = vector.extract_strided_slice %24 {offsets = [0, 4], sizes = [2, 1], strides = [1, 1]} : vector<2x8xf32> to vector<2x1xf32>
    %81 = vector.broadcast %80 : vector<2x1xf32> to vector<2x32xf32>
    %82 = arith.mulf %81, %79 : vector<2x32xf32>
    %83 = arith.addf %47, %82 : vector<2x32xf32>
    %c0_42 = arith.constant 0 : index
    %c160 = arith.constant 160 : index
    %84 = vector.load %arg5[%c0_42, %c160] : memref<32x256xbf16, #tpu.memory_space<vmem>>, vector<32x32xbf16>
    %cst_43 = arith.constant dense<0.000000e+00> : vector<2x32xf32>
    %85 = tpu.matmul %34, %84, %cst_43 {dimension_numbers = #tpu.dot_dimension_numbers<[1], [0], [0], [1], [0, 0, 1, 1], [], []>} : vector<2x32xbf16>, vector<32x32xbf16>, vector<2x32xf32> -> vector<2x32xf32>
    %c0_44 = arith.constant 0 : index
    %c160_45 = arith.constant 160 : index
    %86 = vector.load %arg6[%c0_44, %c160_45] : memref<1x256xf32, #tpu.memory_space<vmem>>, vector<1x32xf32>
    %87 = vector.broadcast %86 : vector<1x32xf32> to vector<2x32xf32>
    %88 = arith.addf %85, %87 : vector<2x32xf32>
    %89 = vector.extract_strided_slice %24 {offsets = [0, 5], sizes = [2, 1], strides = [1, 1]} : vector<2x8xf32> to vector<2x1xf32>
    %90 = vector.broadcast %89 : vector<2x1xf32> to vector<2x32xf32>
    %91 = arith.mulf %90, %88 : vector<2x32xf32>
    %92 = arith.addf %56, %91 : vector<2x32xf32>
    %c0_46 = arith.constant 0 : index
    %c192 = arith.constant 192 : index
    %93 = vector.load %arg5[%c0_46, %c192] : memref<32x256xbf16, #tpu.memory_space<vmem>>, vector<32x32xbf16>
    %cst_47 = arith.constant dense<0.000000e+00> : vector<2x32xf32>
    %94 = tpu.matmul %34, %93, %cst_47 {dimension_numbers = #tpu.dot_dimension_numbers<[1], [0], [0], [1], [0, 0, 1, 1], [], []>} : vector<2x32xbf16>, vector<32x32xbf16>, vector<2x32xf32> -> vector<2x32xf32>
    %c0_48 = arith.constant 0 : index
    %c192_49 = arith.constant 192 : index
    %95 = vector.load %arg6[%c0_48, %c192_49] : memref<1x256xf32, #tpu.memory_space<vmem>>, vector<1x32xf32>
    %96 = vector.broadcast %95 : vector<1x32xf32> to vector<2x32xf32>
    %97 = arith.addf %94, %96 : vector<2x32xf32>
    %98 = vector.extract_strided_slice %24 {offsets = [0, 6], sizes = [2, 1], strides = [1, 1]} : vector<2x8xf32> to vector<2x1xf32>
    %99 = vector.broadcast %98 : vector<2x1xf32> to vector<2x32xf32>
    %100 = arith.mulf %99, %97 : vector<2x32xf32>
    %101 = arith.addf %65, %100 : vector<2x32xf32>
    %c0_50 = arith.constant 0 : index
    %c224 = arith.constant 224 : index
    %102 = vector.load %arg5[%c0_50, %c224] : memref<32x256xbf16, #tpu.memory_space<vmem>>, vector<32x32xbf16>
    %cst_51 = arith.constant dense<0.000000e+00> : vector<2x32xf32>
    %103 = tpu.matmul %34, %102, %cst_51 {dimension_numbers = #tpu.dot_dimension_numbers<[1], [0], [0], [1], [0, 0, 1, 1], [], []>} : vector<2x32xbf16>, vector<32x32xbf16>, vector<2x32xf32> -> vector<2x32xf32>
    %c0_52 = arith.constant 0 : index
    %c224_53 = arith.constant 224 : index
    %104 = vector.load %arg6[%c0_52, %c224_53] : memref<1x256xf32, #tpu.memory_space<vmem>>, vector<1x32xf32>
    %105 = vector.broadcast %104 : vector<1x32xf32> to vector<2x32xf32>
    %106 = arith.addf %103, %105 : vector<2x32xf32>
    %107 = vector.extract_strided_slice %24 {offsets = [0, 7], sizes = [2, 1], strides = [1, 1]} : vector<2x8xf32> to vector<2x1xf32>
    %108 = vector.broadcast %107 : vector<2x1xf32> to vector<2x32xf32>
    %109 = arith.mulf %108, %106 : vector<2x32xf32>
    %110 = arith.addf %74, %109 : vector<2x32xf32>
    %111 = arith.addf %83, %92 : vector<2x32xf32>
    %112 = arith.addf %111, %101 : vector<2x32xf32>
    %113 = arith.addf %112, %110 : vector<2x32xf32>
    %c0_54 = arith.constant 0 : index
    %c0_55 = arith.constant 0 : index
    %114 = vector.load %arg9[%c0_54, %c0_55] : memref<2x32xf32, #tpu.memory_space<vmem>>, vector<2x32xf32>
    tpu.vector_store %arg9[%c0_54, %c0_55], %113 {strides = array<i32>} : memref<2x32xf32, #tpu.memory_space<vmem>>, vector<2x32xf32>,
    return
  }
  func.func @transform_0(%arg0: i32) -> (i32, i32) {
    %c0_i32 = arith.constant 0 : i32
    %c0_i32_0 = arith.constant 0 : i32
    return %arg0, %c0_i32 : i32, i32
  }
  func.func @transform_1(%arg0: i32) -> (i32, i32) {
    %c0_i32 = arith.constant 0 : i32
    %c0_i32_0 = arith.constant 0 : i32
    return %arg0, %c0_i32 : i32, i32
  }
  func.func @transform_2(%arg0: i32) -> (i32, i32) {
    %c0_i32 = arith.constant 0 : i32
    %c0_i32_0 = arith.constant 0 : i32
    %c0_i32_1 = arith.constant 0 : i32
    return %c0_i32, %c0_i32_0 : i32, i32
  }
  func.func @transform_3(%arg0: i32) -> (i32, i32) {
    %c0_i32 = arith.constant 0 : i32
    %c0_i32_0 = arith.constant 0 : i32
    %c0_i32_1 = arith.constant 0 : i32
    return %c0_i32, %c0_i32_0 : i32, i32
  }
  func.func @transform_4(%arg0: i32) -> (i32, i32) {
    %c0_i32 = arith.constant 0 : i32
    %c0_i32_0 = arith.constant 0 : i32
    %c0_i32_1 = arith.constant 0 : i32
    return %c0_i32, %c0_i32_0 : i32, i32
  }
  func.func @transform_5(%arg0: i32) -> (i32, i32) {
    %c0_i32 = arith.constant 0 : i32
    %c0_i32_0 = arith.constant 0 : i32
    %c0_i32_1 = arith.constant 0 : i32
    return %c0_i32, %c0_i32_0 : i32, i32
  }
  func.func @transform_6(%arg0: i32) -> (i32, i32) {
    %c0_i32 = arith.constant 0 : i32
    %c0_i32_0 = arith.constant 0 : i32
    %c0_i32_1 = arith.constant 0 : i32
    return %c0_i32, %c0_i32_0 : i32, i32
  }
  func.func @transform_7(%arg0: i32) -> (i32, i32) {
    %c0_i32 = arith.constant 0 : i32
    %c0_i32_0 = arith.constant 0 : i32
    %c0_i32_1 = arith.constant 0 : i32
    return %c0_i32, %c0_i32_0 : i32, i32
  }
  func.func @transform_8(%arg0: i32) -> (i32, i32) {
    %c0_i32 = arith.constant 0 : i32
    %c0_i32_0 = arith.constant 0 : i32
    return %arg0, %c0_i32 : i32, i32
  }
}

</mosaic_0001>

<bundles_post_ra>
// kernel: intervention_weight_model.1
= control target key start
LH: loop header
LB: loop body
LE: loop exit
PB: predicated region body
PF: predicated region fallthrough
CT: control target
= control target key end

     0   :  { %13 = vsyncpa [#allocation3], 0  ;;  %s1081_s0 = inlined_call_operand.hbm [shape: f32[2,8], index: 0, kind: input, shape index: {}]   ;;  %s1082_s1 = inlined_call_operand.vmem [shape: f32[2,4], index: 1, kind: input, shape index: {}]   ;;  %s1083_s2 = inlined_call_operand.vmem [shape: bf16[4,32], index: 2, kind: input, shape index: {}]   ;;  %s1084_s3 = inlined_call_operand.vmem [shape: f32[1,32], index: 3, kind: input, shape index: {}]   ;;  %s1085_s4 = inlined_call_operand.hbm [shape: bf16[32,256], index: 4, kind: input, shape index: {}]   ;;  %s1086_s5 = inlined_call_operand.vmem [shape: f32[1,256], index: 5, kind: input, shape index: {}]   ;;  %s1087_s6 = inlined_call_operand.vmem [shape: f32[1,8], index: 6, kind: input, shape index: {}]   ;;  %s1088_s7 = inlined_call_operand.vmem [shape: f32[1,8], index: 7, kind: input, shape index: {}]   ;;  %s1089_s8 = inlined_call_operand.hbm [shape: f32[2,32], index: 8, kind: output, shape index: {}]  }
   0x1   :  { %14 = vsyncpa [#allocation6], 0 }
   0x2   :  { %15 = vsyncpa [#allocation4], 0  ;;  %s863_s27 = smov [#allocation2]   ;;  %s864_s29 = smov [#allocation5]  }
   0x3   :  { %s22_s28 = sshll.u32 %s863_s27, 4  ;;  %s37_s30 = sshll.u32 %s864_s29, 4  ;;  %s23_s28 = int_to_ptr.vmem [resolvable:$true] %s22_s28  ;;  %s926_s30 = int_to_ptr.vmem [resolvable:$true] %s37_s30 }
   0x4   :  { %s791_s11 = scalar_lea.hbm %s1081_s0, 32 }
   0x5   :  { %p792_p0 = scmp.ne.s32.totalorder %s1081_s0, %s791_s11  ;;  %p795_p1 = scmp.lt.u32.totalorder %s791_s11, %s1081_s0 }
   0x7   :  { %p797_p2 = pnand %p795_p1, %p792_p0 }
   0x9   :  { %800 = shalt.err (!%p797_p2)
}
   0xa   :  { %s801_s16 = scalar_lea.vmem %s23_s28, 32  ;;  %p806_p4 = scmp.lt.s32.totalorder %s23_s28, %s23_s28 }
   0xb   :  { %p802_p3 = scmp.ne.s32.totalorder %s23_s28, %s801_s16  ;;  %p807_p5 = scmp.lt.s32.totalorder %s801_s16, %s801_s16 }
   0xd   :  { %p808_p6 = por %p807_p5, %p806_p4 }
   0xf   :  { %p809_p7 = pnand %p808_p6, %p802_p3 }
  0x11   :  { %812 = shalt.err (!%p809_p7)
}
  0x12   :  { %25 = dma.hbm_to_vmem [thread:$0]  %s1081_s0, 32, %s23_s28, [#allocation3]  }
  0x13   :  { %s813_s21 = scalar_lea.hbm %s1085_s4, 512 }
  0x14   :  { %p814_p8 = scmp.ne.s32.totalorder %s1085_s4, %s813_s21  ;;  %p817_p9 = scmp.lt.u32.totalorder %s813_s21, %s1085_s4 }
  0x16   :  { %p819_p10 = pnand %p817_p9, %p814_p8 }
  0x18   :  { %822 = shalt.err (!%p819_p10)
}
  0x19   :  { %s823_s26 = scalar_lea.vmem %s926_s30, 512  ;;  %p828_p12 = scmp.lt.s32.totalorder %s926_s30, %s926_s30 }
  0x1a   :  { %p824_p11 = scmp.ne.s32.totalorder %s926_s30, %s823_s26  ;;  %p829_p13 = scmp.lt.s32.totalorder %s823_s26, %s823_s26 }
  0x1c   :  { %p830_p0 = por %p829_p13, %p828_p12 }
  0x1e   :  { %p831_p1 = pnand %p830_p0, %p824_p11 }
  0x20   :  { %834 = shalt.err (!%p831_p1)
}
  0x21   :  { %s865_s0 = smov 128   ;;  %s866_s27 = smov 8  }
  0x22   :  { %43 = dma.hbm_to_vmem [thread:$0]  %s1085_s4, 512, %s926_s30, [#allocation6], %s865_s0, %s865_s0, %s866_s27  }
  0x23   :  { %857 = dma.done.wait [#allocation3], 32  }
  0x24   :  { %858 = vsyncadd [#allocation3], 4294967264 }
  0x25   :  { %859 = dma.done.wait [#allocation6], 512  }
  0x26   :  { %860 = vsyncadd [#allocation6], 4294966784  ;;  %v867_v0 = vmov 0.0   ;;  %vm868_vm0 = vmmov 0   ;;  %vm104_vm1 = vcmask 1041408   ;;  %vm100_vm2 = vcmask 31744  }
  0x27   :  { %688 = vmatprep.subr.bf16.mxu0 %v867_v0  ;;  %690 = vmatprep.mubr.msk.bf16.mxu0 %vm868_vm0, %v867_v0  ;;  %v92_v1 = vld [vmem:[%s1083_s2] sm:$0x3]  ;;  %v785_v5 = vld [vmem:[#allocation5] ss:$8 sps:$4 sm:$0xff]   ;;  %s869_s11 = smov 64   ;;  %s870_s12 = smov 96  }
  0x28   :  { %694 = vmatprep.subr.bf16.mxu1 %v867_v0  ;;  %698 = vmatprep.mubr.msk.bf16.mxu1 %vm868_vm0, %v867_v0  ;;  %v90_v2 = vld [vmem:[%s1082_s1] sm:$0x3]  ;;  %v106_v3 = vsel %vm104_vm1, %v92_v1, 0  ;;  %v786_v6 = vld [vmem:[#allocation5 + $0x10] ss:$8 sps:$4 sm:$0xff]   ;;  %s871_s1 = smov 32  }
  0x29   :  { %v91_v4 = vpack.c.bf16 %v90_v2, %v90_v2  ;;  %689 = vmatpush3.bf16.msra.mxu0 %v106_v3  ;;  %279 = vrot.lane.b32.xlu1 %v785_v5, %s869_s11  ;;  %v980_v7 = vld [vmem:[#allocation5 + $0x14] ss:$8 sps:$4 sm:$0xff]   ;;  %v982_v8 = vld [vmem:[#allocation5 + $0x4] ss:$8 sps:$4 sm:$0xff]   ;;  %vm58_vm3 = vcmask 58368   ;;  %v872_v15 = vmov 1  }
  0x2a   :  { %224 = vrot.lane.b32.xlu0 %v785_v5, %s870_s12  ;;  %702 = vmatprep.subr.bf16.mxu0 %v867_v0  ;;  %v57_v9 = vld [vmem:[#allocation2] sm:$0x3]  ;;  %v873_v18 = vmov 0   ;;  %vm173_vm4 = vcmask 261120   ;;  %v874_v51 = vmov 4   ;;  %v875_v52 = vmov 7  }
  0x2b   :  { %695 = vmatpush3.bf16.msra.mxu1 %v785_v5  ;;  %v59_v10 = vsel %vm58_vm3, %v57_v9, 0.0  ;;  %v63_v11 = vmul.f32 %v57_v9, %v57_v9  ;;  %v999_v13 = vld [vmem:[%s1086_s5 + $0x1] ss:$0 sm:$0xff]  ;;  %777 = vset.pattern.permute.xlu1 %v872_v15  ;;  %v1008_v17 = vld [vmem:[%s1086_s5] ss:$0 sm:$0xff]  ;;  %v876_v53 = vmov 5  }
  0x2c   :  { %691 = vmatmul.mubr.msk.bf16.vlgmr.msra.gmra.mrb[0].mxu0 %vm100_vm2, %v91_v4  ;;  %696 = vmatprep.subr.bf16.mxu1 %v867_v0  ;;  %v646_v36 = vld [vmem:[%s1084_s3] ss:$0 sm:$0xff]  ;;  %v877_v54 = vmov 2   ;;  %v878_v55 = vmov 6   ;;  %v879_v56 = vmov 3   ;;  %s880_s3 = smov [#allocation7]  }
  0x2d   :  { %706 = vmatprep.mubr.msk.bf16.mxu0 %vm868_vm0, %v867_v0  ;;  %334 = vrot.lane.b32.xlu1 %v785_v5, %s871_s1  ;;  %v64_v12 = vsel %vm58_vm3, %v63_v11, 0.0  ;;  %v644_v42 = vld [vmem:[%s1087_s6] ss:$0 sm:$0xff]  ;;  %s634_s6 = sshll.u32 %s880_s3, 4  ;;  %vm626_vm5 = vcmask 254976   ;;  %s635_s6 = int_to_ptr.vmem [resolvable:$true] %s634_s6 }
  0x2e   :  { %226 = vrot.lane.b32.xlu0 %v786_v6, %s870_s12  ;;  %v645_v47 = vld [vmem:[%s1088_s7] ss:$0 sm:$0xff]  ;;  %s835_s7 = scalar_lea.vmem %s635_s6, 32  ;;  %p840_p3 = scmp.lt.s32.totalorder %s635_s6, %s635_s6 }
  0x2f   :  { %697 = vmatpush3.bf16.msra.mxu1 %v786_v6  ;;  %776 = vset.pattern.permute.xlu0 %v873_v18  ;;  %p836_p2 = scmp.ne.s32.totalorder %s635_s6, %s835_s7  ;;  %p841_p4 = scmp.lt.s32.totalorder %s835_s7, %s835_s7 }
  0x30   :  { %710 = vmatprep.subr.bf16.mxu1 %v867_v0 }
  0x31   :  { %336 = vrot.lane.b32.xlu1 %v786_v6, %s871_s1  ;;  %p842_p5 = por %p841_p4, %p840_p3 }
  0x32   :  { %281 = vrot.lane.b32.xlu0 %v786_v6, %s869_s11 }
  0x33   :  { %p843_p6 = pnand %p842_p5, %p836_p2 }
  0x35   :  { %460 = vrot.lane.b32.xlu1 %v980_v7, %s870_s12 }
  0x36   :  { %458 = vrot.lane.b32.xlu0 %v982_v8, %s870_s12 }
  0x39   :  { %568 = vrot.lane.b32.xlu1 %v982_v8, %s871_s1 }
  0x3a   :  { %513 = vrot.lane.b32.xlu0 %v982_v8, %s869_s11 }
  0x3d   :  { %570 = vrot.lane.b32.xlu1 %v980_v7, %s871_s1 }
  0x3e   :  { %515 = vrot.lane.b32.xlu0 %v980_v7, %s869_s11 }
  0x5d   :  { %60 = vadd.xlane.f32.xlu0 %v59_v10 }
  0x61   :  { %65 = vadd.xlane.f32.xlu1 %v64_v12 }
  0x72   :  { %464 = vrot.lane.b32.xlu1 %v999_v13, %s870_s12 }
  0x73   :  { %230 = vrot.lane.b32.xlu0 %v1008_v17, %s870_s12 }
  0x9b   :  { %v280_v19 = vpop.permute.xlu1 %279 }
  0x9c   :  { %v225_v14 = vpop.permute.xlu0 %224 }
  0x9d   :  { %703 = vmatpush3.bf16.msra.mxu0 %v225_v14 }
  0x9e   :  { %704 = vmatprep.subr.bf16.mxu0 %v867_v0 }
  0x9f   :  { %v335_v20 = vpop.permute.xlu1 %334 }
  0xa0   :  { %v227_v16 = vpop.permute.xlu0 %226 }
  0xa1   :  { %705 = vmatpush3.bf16.msra.mxu0 %v227_v16 }
  0xa2   :  { %718 = vmatprep.subr.bf16.mxu0 %v867_v0 }
  0xa3   :  { %v337_v22 = vpop.permute.xlu1 %336 }
  0xa4   :  { %v282_v21 = vpop.permute.xlu0 %281 }
  0xa7   :  { %v461_v24 = vpop.permute.xlu1 %460 }
  0xa8   :  { %v459_v23 = vpop.permute.xlu0 %458 }
  0xab   :  { %v569_v26 = vpop.permute.xlu1 %568 }
  0xac   :  { %v514_v25 = vpop.permute.xlu0 %513 }
  0xaf   :  { %v1014_v29 = vpop.permute.xlu1 %570 }
  0xb0   :  { %v1012_v27 = vpop.permute.xlu0 %515 }
  0xea   :  { %v61_v28 = vpop.xlane.xlu0 %60 }
  0xeb   :  { %v62_v30 = vmul.f32 0.125, %v61_v28 }
  0xed   :  { %v68_v31 = vmul.f32 %v62_v30, %v62_v30  ;;  %v70_v37 = vsub.f32 %v57_v9, %v62_v30 }
  0xee   :  { %v66_v32 = vpop.xlane.xlu1 %65 }
  0xef   :  { %v67_v33 = vmul.f32 0.125, %v66_v32 }
  0xf1   :  { %v69_v34 = vsub.f32 %v67_v33, %v68_v31 }
  0xf2   :  { %v465_v57 = vpop.permute.xlu1 %464 }
  0xf3   :  { %v71_v35 = vadd.f32 1e-05, %v69_v34 }
  0xf5   :  { %789 = vrsqrt.f32 %v71_v35 }
  0xff   :  { %v142_v38 = vpop.f32.mrb[0].mxu0  ;;  %v790_v39 = vpop.eup %789 }
 0x100   :  { %v143_v40 = vadd.f32 %v646_v36, %v142_v38  ;;  %v692_v41 = vpop.f32.mrb[1].mxu0  ;;  %v73_v44 = vmul.f32 %v790_v39, %v70_v37 }
 0x101   :  { %v145_v43 = vpop.f32.mrb[2].mxu0 }
 0x102   :  { %v148_v45 = vmax.f32 %v143_v40, 0.0  ;;  %v693_v46 = vpop.f32.mrb[3].mxu0  ;;  %v81_v48 = vmul.f32 %v644_v42, %v73_v44 }
 0x104   :  { %v149_v49 = vpack.c.bf16 %v148_v45, %v148_v45  ;;  %v89_v50 = vadd.f32 %v645_v47, %v81_v48 }
 0x106   :  { %699 = vmatmul.mubr.msk.bf16.vlgmr.msra.gmra.mrb[0].mxu1 %vm173_vm4, %v149_v49  ;;  %707 = vmatmul.mubr.msk.bf16.vlgmr.msra.gmra.mrb[4].mxu0 %vm173_vm4, %v149_v49 }
 0x107   :  { %711 = vmatpush3.bf16.msra.mxu1 %v280_v19  ;;  %719 = vmatpush3.bf16.msra.mxu0 %v335_v20 }
 0x108   :  { %712 = vmatprep.subr.bf16.mxu1 %v867_v0  ;;  %720 = vmatprep.subr.bf16.mxu0 %v867_v0 }
 0x109   :  { %714 = vmatprep.mubr.msk.bf16.mxu1 %vm868_vm0, %v867_v0  ;;  %722 = vmatprep.mubr.msk.bf16.mxu0 %vm868_vm0, %v867_v0 }
 0x10a   :  { %274 = vperm.xlu1 %777, %v89_v50   ;;  %219 = vperm.xlu0 %776, %v89_v50  }
 0x10b   :  { %713 = vmatpush3.bf16.msra.mxu1 %v282_v21  ;;  %721 = vmatpush3.bf16.msra.mxu0 %v337_v22 }
 0x10c   :  { %726 = vmatprep.subr.bf16.mxu1 %v867_v0  ;;  %734 = vmatprep.subr.bf16.mxu0 %v867_v0 }
 0x10e   :  { %715 = vmatmul.mubr.msk.bf16.vlgmr.msra.gmra.mrb[4].mxu1 %vm173_vm4, %v149_v49  ;;  %723 = vmatmul.mubr.msk.bf16.vlgmr.msra.gmra.mrb[8].mxu0 %vm173_vm4, %v149_v49 }
 0x10f   :  { %727 = vmatpush3.bf16.msra.mxu1 %v982_v8  ;;  %735 = vmatpush3.bf16.msra.mxu0 %v459_v23 }
 0x110   :  { %728 = vmatprep.subr.bf16.mxu1 %v867_v0  ;;  %736 = vmatprep.subr.bf16.mxu0 %v867_v0 }
 0x111   :  { %730 = vmatprep.mubr.msk.bf16.mxu1 %vm868_vm0, %v867_v0  ;;  %738 = vmatprep.mubr.msk.bf16.mxu0 %vm868_vm0, %v867_v0 }
 0x112   :  { %778 = vset.pattern.permute.xlu1 %v874_v51  ;;  %285 = vrot.lane.b32.xlu0 %v1008_v17, %s869_s11 }
 0x113   :  { %729 = vmatpush3.bf16.msra.mxu1 %v980_v7  ;;  %737 = vmatpush3.bf16.msra.mxu0 %v461_v24 }
 0x114   :  { %742 = vmatprep.subr.bf16.mxu1 %v867_v0  ;;  %750 = vmatprep.subr.bf16.mxu0 %v867_v0 }
 0x115   :  { %453 = vperm.xlu1 %778, %v89_v50   ;;  %784 = vset.pattern.permute.xlu0 %v875_v52 }
 0x116   :  { %731 = vmatmul.mubr.msk.bf16.vlgmr.msra.gmra.mrb[8].mxu1 %vm173_vm4, %v149_v49  ;;  %739 = vmatmul.mubr.msk.bf16.vlgmr.msra.gmra.mrb[12].mxu0 %vm173_vm4, %v149_v49 }
 0x117   :  { %743 = vmatpush3.bf16.msra.mxu1 %v514_v25  ;;  %751 = vmatpush3.bf16.msra.mxu0 %v569_v26 }
 0x118   :  { %744 = vmatprep.subr.bf16.mxu1 %v867_v0  ;;  %752 = vmatprep.subr.bf16.mxu0 %v867_v0 }
 0x119   :  { %746 = vmatprep.mubr.msk.bf16.mxu1 %vm868_vm0, %v867_v0  ;;  %754 = vmatprep.mubr.msk.bf16.mxu0 %vm868_vm0, %v867_v0  ;;  %v231_v0 = vpop.permute.xlu0 %230 }
 0x11a   :  { %779 = vset.pattern.permute.xlu1 %v876_v53  ;;  %340 = vrot.lane.b32.xlu0 %v1008_v17, %s871_s1 }
 0x11b   :  { %745 = vmatpush3.bf16.msra.mxu1 %v1012_v27  ;;  %753 = vmatpush3.bf16.msra.mxu0 %v1014_v29 }
 0x11c   :  { %508 = vperm.xlu1 %779, %v89_v50  }
 0x11e   :  { %747 = vmatmul.mubr.msk.bf16.vlgmr.msra.gmra.mrb[12].mxu1 %vm173_vm4, %v149_v49  ;;  %755 = vmatmul.mubr.msk.bf16.vlgmr.msra.gmra.mrb[16].mxu0 %vm173_vm4, %v149_v49 }
 0x120   :  { %780 = vset.pattern.permute.xlu1 %v877_v54 }
 0x121   :  { %329 = vperm.xlu1 %780, %v89_v50  }
 0x125   :  { %781 = vset.pattern.permute.xlu1 %v878_v55 }
 0x126   :  { %563 = vperm.xlu1 %781, %v89_v50  }
 0x12a   :  { %782 = vset.pattern.permute.xlu1 %v879_v56 }
 0x12b   :  { %384 = vperm.xlu1 %782, %v89_v50  }
 0x12f   :  { %783 = vset.pattern.permute.xlu1 %v875_v52 }
 0x130   :  { %618 = vperm.xlu1 %783, %v89_v50  }
 0x134   :  { %519 = vrot.lane.b32.xlu1 %v999_v13, %s869_s11 }
 0x138   :  { %574 = vrot.lane.b32.xlu1 %v999_v13, %s871_s1 }
 0x189   :  { %v275_v58 = vpop.permute.xlu1 %274  ;;  %v220_v10 = vpop.permute.xlu0 %219 }
 0x18d   :  { %v286_v21 = vpop.permute.xlu0 %285 }
 0x191   :  { %v341_v39 = vpop.permute.xlu0 %340 }
 0x194   :  { %v454_v59 = vpop.permute.xlu1 %453 }
 0x19b   :  { %v509_v60 = vpop.permute.xlu1 %508 }
 0x1a0   :  { %v330_v61 = vpop.permute.xlu1 %329 }
 0x1a5   :  { %v564_v62 = vpop.permute.xlu1 %563 }
 0x1aa   :  { %v385_v63 = vpop.permute.xlu1 %384 }
 0x1af   :  { %v619_v9 = vpop.permute.xlu1 %618 }
 0x1b3   :  { %v520_v24 = vpop.permute.xlu1 %519 }
 0x1b7   :  { %v575_v41 = vpop.permute.xlu1 %574 }
 0x1d9   :  { %v211_v1 = vpop.f32.mrb[0].mxu1  ;;  %v267_v2 = vpop.f32.mrb[4].mxu0 }
 0x1da   :  { %v700_v3 = vpop.f32.mrb[1].mxu1  ;;  %v708_v4 = vpop.f32.mrb[5].mxu0  ;;  %v212_v22 = vadd.f32 %v1008_v17, %v211_v1  ;;  %v268_v23 = vadd.f32 %v267_v2, %v231_v0 }
 0x1db   :  { %v214_v5 = vpop.f32.mrb[2].mxu1  ;;  %v270_v6 = vpop.f32.mrb[6].mxu0 }
 0x1dc   :  { %v701_v7 = vpop.f32.mrb[3].mxu1  ;;  %v709_v8 = vpop.f32.mrb[7].mxu0  ;;  %v222_v33 = vmul.f32 %v220_v10, %v212_v22  ;;  %v277_v34 = vmul.f32 %v275_v58, %v268_v23 }
 0x1e1   :  { %v322_v11 = vpop.f32.mrb[4].mxu1  ;;  %v377_v12 = vpop.f32.mrb[8].mxu0 }
 0x1e2   :  { %v716_v14 = vpop.f32.mrb[5].mxu1  ;;  %v724_v15 = vpop.f32.mrb[9].mxu0  ;;  %v323_v42 = vadd.f32 %v322_v11, %v286_v21  ;;  %v378_v43 = vadd.f32 %v377_v12, %v341_v39 }
 0x1e3   :  { %v325_v16 = vpop.f32.mrb[6].mxu1  ;;  %v380_v18 = vpop.f32.mrb[10].mxu0 }
 0x1e4   :  { %v717_v19 = vpop.f32.mrb[7].mxu1  ;;  %v725_v20 = vpop.f32.mrb[11].mxu0  ;;  %v332_v52 = vmul.f32 %v330_v61, %v323_v42  ;;  %v387_v53 = vmul.f32 %v385_v63, %v378_v43 }
 0x1e9   :  { %v446_v25 = vpop.f32.mrb[8].mxu1  ;;  %v501_v26 = vpop.f32.mrb[12].mxu0 }
 0x1ea   :  { %v447_v27 = vadd.f32 %v999_v13, %v446_v25  ;;  %v502_v28 = vadd.f32 %v501_v26, %v465_v57  ;;  %v732_v29 = vpop.f32.mrb[9].mxu1  ;;  %v740_v30 = vpop.f32.mrb[13].mxu0 }
 0x1eb   :  { %v449_v31 = vpop.f32.mrb[10].mxu1  ;;  %v504_v32 = vpop.f32.mrb[14].mxu0 }
 0x1ec   :  { %v456_v35 = vmul.f32 %v454_v59, %v447_v27  ;;  %v511_v36 = vmul.f32 %v509_v60, %v502_v28  ;;  %v733_v37 = vpop.f32.mrb[11].mxu1  ;;  %v741_v38 = vpop.f32.mrb[15].mxu0 }
 0x1ee   :  { %v457_v40 = vadd.f32 %v456_v35, %v222_v33  ;;  %v512_v17 = vadd.f32 %v511_v36, %v277_v34 }
 0x1f0   :  { %v623_v44 = vadd.f32 %v512_v17, %v457_v40 }
 0x1f1   :  { %v556_v45 = vpop.f32.mrb[12].mxu1  ;;  %v611_v13 = vpop.f32.mrb[16].mxu0 }
 0x1f2   :  { %v557_v46 = vadd.f32 %v556_v45, %v520_v24  ;;  %v612_v47 = vadd.f32 %v611_v13, %v575_v41  ;;  %v748_v48 = vpop.f32.mrb[13].mxu1  ;;  %v756_v49 = vpop.f32.mrb[17].mxu0 }
 0x1f3   :  { %v559_v50 = vpop.f32.mrb[14].mxu1  ;;  %v614_v51 = vpop.f32.mrb[18].mxu0 }
 0x1f4   :  { %v566_v54 = vmul.f32 %v564_v62, %v557_v46  ;;  %v621_v55 = vmul.f32 %v619_v9, %v612_v47  ;;  %v749_v56 = vpop.f32.mrb[15].mxu1  ;;  %v757_v57 = vpop.f32.mrb[19].mxu0 }
 0x1f6   :  { %v567_v58 = vadd.f32 %v566_v54, %v332_v52  ;;  %v622_v59 = vadd.f32 %v621_v55, %v387_v53 }
 0x1f8   :  { %v624_v60 = vadd.f32 %v623_v44, %v567_v58 }
 0x1fa   :  { %v625_v0 = vadd.f32 %v624_v60, %v622_v59 }
 0x1fc   :  { %627 = vst.msk [vmem:[#allocation7] sm:$0x3] %vm626_vm5, %v625_v0 }
 0x1fd   :  { %846 = shalt.err (!%p843_p6)
}
 0x1fe   :  { %s847_s23 = scalar_lea.hbm %s1089_s8, 32 }
 0x1ff   :  { %p848_p7 = scmp.ne.s32.totalorder %s1089_s8, %s847_s23  ;;  %p851_p8 = scmp.lt.u32.totalorder %s847_s23, %s1089_s8 }
 0x201   :  { %p853_p9 = pnand %p851_p8, %p848_p7 }
 0x203   :  { %856 = shalt.err (!%p853_p9)
}
 0x204   :  { %637 = dma.vmem_to_hbm [thread:$0]  %s635_s6, 32, %s1089_s8, [#allocation4]  }
 0x205   :  { %861 = dma.done.wait [#allocation4], 32  }
 0x206   :  { %862 = vsyncadd [#allocation4], 4294967264 }
 0x207   :  { %641 = vsyncpa [#allocation3], 1 }
 0x208   :  { %642 = vsyncpa [#allocation6], 1 }
 0x209   :  { %643 = vsyncpa [#allocation4], 1 }

</bundles_post_ra>
